<compile_context>
chip_gen: v5e
topology: v5e:2x2
jax: 0.10.0
libtpu: 0.0.40
codegen_flags: <defaults>
</compile_context>

<pallas_src>
import jax
import jax.numpy as jnp
from jax.experimental import pallas as pl
from jax.experimental.pallas import tpu as pltpu

LANE = 128


def _round_up(x, m):
    return ((x + m - 1) // m) * m


def _vmem_limit_bytes():
    """Generation-aware scoped-VMEM limit (explicit, per review)."""
    cap = 128 * 1024 * 1024  # v5e/v6e physical VMEM
    try:
        cap = int(pltpu.get_tpu_info().vmem_capacity_bytes)
    except Exception:
        pass
    # v5e/v6e: 64 MiB (raises the 16/32 MiB scoped default); v7x (64 MiB
    # physical): 48 MiB, leaving headroom for compiler-internal scratch.
    return min(64 * 1024 * 1024, (cap * 3) // 4)


# ---------------------------------------------------------------------------
# Stage 1: h = x @ W   (computed once; bf16 MXU inputs, f32 accumulation)
# ---------------------------------------------------------------------------
def xw_kernel(x_ref, w_ref, h_ref):
    h_ref[...] = jnp.dot(
        x_ref[...], w_ref[...], preferred_element_type=jnp.float32
    ).astype(h_ref.dtype)


def _pick_xw_tile(M, Dp, Hp, budget):
    tm = 128
    for cand in (1024, 512, 256, 128):
        if M % cand:
            continue
        vm = 2 * cand * Dp * 2 + 2 * Dp * Hp * 2 + 2 * cand * Hp * 2
        if vm <= budget:
            tm = cand
            break
    # keep >=2 grid steps when possible so both v7x TensorCores get work
    while tm > 128 and M // tm < 2:
        tm //= 2
    return tm


# ---------------------------------------------------------------------------
# Stage 2: aggregation  acc += adj @ h ; out = x + relu(acc * invdeg + bias)
# ---------------------------------------------------------------------------
def gcn_agg_kernel(h_ref, x_res_ref, adj_ref, invdeg_ref, b_ref, o_ref, acc_ref):
    # h_ref     : (TB, TK, Hp) bf16   precomputed h tiles along the K axis
    # x_res_ref : (TB, TN, Hp)        residual input (original dtype)
    # adj_ref   : (TB, TN, TK) int8   adjacency tile (0/1)
    # invdeg_ref: (TB, TN, 1)  f32    precomputed 1/deg
    # b_ref     : (1, Hp)      f32    bias (constant index map -> fetched once)
    # o_ref     : (TB, TN, Hp)        output tile
    # acc_ref   : (TB, TN, Hp) f32    VMEM accumulator
    k = pl.program_id(2)

    @pl.when(k == 0)
    def _init():
        acc_ref[...] = jnp.zeros_like(acc_ref)

    # int8 -> bf16 convert rides on VPU slack; MXU does the batched matmul.
    adj = adj_ref[...].astype(jnp.bfloat16)
    acc_ref[...] += jnp.einsum(
        "bnk,bkh->bnh", adj, h_ref[...], preferred_element_type=jnp.float32
    )

    @pl.when(k == pl.num_programs(2) - 1)
    def _finalize():
        dst = acc_ref[...] * invdeg_ref[...] + b_ref[...].astype(jnp.float32)
        out = jnp.maximum(dst, 0.0)  # ReLU (dropout = identity in eval mode)
        o_ref[...] = (x_res_ref[...].astype(jnp.float32) + out).astype(o_ref.dtype)


def _agg_vmem_bytes(tb, tn, tk, Hp, out_bytes):
    """Double-buffered working set of the aggregation kernel (bytes)."""
    h_b = 2 * tb * tk * Hp * 2          # bf16
    xr_b = 2 * tb * tn * Hp * out_bytes  # residual (orig dtype)
    adj_b = 2 * tb * tn * tk * 1         # int8
    inv_b = 2 * tb * tn * LANE * 4       # (tb,tn,1) f32, lane-padded to 128
    bias_b = 2 * 8 * Hp * 4              # (1,Hp) f32, sublane-padded
    out_b = 2 * tb * tn * Hp * out_bytes
    acc_b = tb * tn * Hp * 4             # f32 scratch
    return h_b + xr_b + adj_b + inv_b + bias_b + out_b + acc_b


def _pick_agg_tiling(B, Np, Hp, out_bytes, budget):
    candidates = []
    min_parallel_possible = B * (Np // LANE) >= 2
    for tb in (8, 4, 2, 1):
        if B % tb:
            continue
        for tn in (512, 256, 128):
            if Np % tn:
                continue
            for tk in (512, 256, 128):
                if Np % tk:
                    continue
                if _agg_vmem_bytes(tb, tn, tk, Hp, out_bytes) > budget:
                    continue
                par = (B // tb) * (Np // tn)           # work on parallel axes
                steps = par * (Np // tk)
                good_parallel = (par >= 2) or (not min_parallel_possible)
                # prefer: both v7x TCs busy, then fewest grid steps, then big K tile
                candidates.append((good_parallel, -steps, tk, tb, tn))
    if not candidates:
        return 1, 128, 128  # minimal fallback (extremely large Hp)
    _, _, tk, tb, tn = max(candidates)
    return tb, tn, tk


# ---------------------------------------------------------------------------
# Wrapper
# ---------------------------------------------------------------------------
def graph_convolution_layer(nodes_embed, node_adj, W, bias, *, tb=None, tn=None, tk=None):
    """Pallas implementation of GraphConvolutionLayer.forward (eval mode).

    Returns (nodes_embed + out, node_adj), mirroring the PyTorch module.
    """
    B, N, D = nodes_embed.shape
    Dw, H = W.shape
    assert D == Dw and D == H, "residual connection requires input_size == hidden_size"

    Np = _round_up(N, LANE)
    Dp = _round_up(D, LANE)
    Hp = _round_up(H, LANE)  # == Dp since D == H

    # ---- pad everything to lane-dense shapes (zeros) ----
    x_pad = nodes_embed
    if (Np, Dp) != (N, D):
        x_pad = jnp.pad(nodes_embed, ((0, 0), (0, Np - N), (0, Dp - D)))
    adj_pad = node_adj
    if Np != N:
        adj_pad = jnp.pad(node_adj, ((0, 0), (0, Np - N), (0, Np - N)))
    w_pad = W if (Dp, Hp) == (D, H) else jnp.pad(W, ((0, Dp - D), (0, Hp - H)))
    b_pad = bias.reshape(1, -1)
    if Hp != H:
        b_pad = jnp.pad(b_pad, ((0, 0), (0, Hp - H)))

    # Exact f32 degrees -> 1/deg precomputed in the wrapper (removes a per-step
    # convert + cross-lane reduce from the kernel).  Padded rows get 1.0 so
    # their (discarded) outputs stay finite.
    inv_deg = 1.0 / jnp.sum(node_adj.astype(jnp.float32), axis=-1, keepdims=True)
    if Np != N:
        inv_deg = jnp.pad(inv_deg, ((0, 0), (0, Np - N), (0, 0)), constant_values=1.0)

    # dtypes: bf16 MXU inputs (0/1 adjacency exact), int8 adjacency stream.
    x_bf = x_pad.astype(jnp.bfloat16)
    w_bf = w_pad.astype(jnp.bfloat16)
    adj_i8 = adj_pad.astype(jnp.int8)      # NOTE: exact only for 0/1 adjacency
    b_f32 = b_pad.astype(jnp.float32)

    vmem_limit = _vmem_limit_bytes()
    budget = (vmem_limit * 7) // 10        # leave pipelining headroom

    # ---- stage 1: h = x @ W, folded over (B, Np) into one M dim ----
    M = B * Np
    tm = _pick_xw_tile(M, Dp, Hp, budget)
    h_bf = pl.pallas_call(
        xw_kernel,
        out_shape=jax.ShapeDtypeStruct((M, Hp), jnp.bfloat16),
        grid_spec=pltpu.PrefetchScalarGridSpec(
            num_scalar_prefetch=0,
            grid=(M // tm,),
            in_specs=[
                pl.BlockSpec((tm, Dp), lambda i: (i, 0)),
                pl.BlockSpec((Dp, Hp), lambda i: (0, 0)),   # W: constant map, DMA'd once
            ],
            out_specs=pl.BlockSpec((tm, Hp), lambda i: (i, 0)),
        ),
        compiler_params=pltpu.CompilerParams(
            dimension_semantics=("parallel",),
            vmem_limit_bytes=vmem_limit),
    )(x_bf.reshape(M, Dp), w_bf).reshape(B, Np, Hp)

    # ---- stage 2: aggregation + normalize + bias + ReLU + residual ----
    if tb is None or tn is None or tk is None:
        atb, atn, atk = _pick_agg_tiling(B, Np, Hp, nodes_embed.dtype.itemsize, budget)
        tb = tb or atb
        tn = tn or atn
        tk = tk or atk
    assert B % tb == 0 and Np % tn == 0 and Np % tk == 0

    grid = (B // tb, Np // tn, Np // tk)

    # Alias the residual input to the output (same shape/dtype) to save one
    # full-size HBM allocation.  Only when x_pad is a fresh intermediate, so
    # the caller's nodes_embed buffer can never be touched.
    io_aliases = {1: 0} if x_pad is not nodes_embed else {}

    out = pl.pallas_call(
        gcn_agg_kernel,
        out_shape=jax.ShapeDtypeStruct((B, Np, Hp), nodes_embed.dtype),
        grid_spec=pltpu.PrefetchScalarGridSpec(
            num_scalar_prefetch=0,
            grid=grid,
            in_specs=[
                pl.BlockSpec((tb, tk, Hp), lambda b, i, k: (b, k, 0)),  # h (bf16, K tile)
                pl.BlockSpec((tb, tn, Hp), lambda b, i, k: (b, i, 0)),  # residual x
                pl.BlockSpec((tb, tn, tk), lambda b, i, k: (b, i, k)),  # adjacency (int8)
                pl.BlockSpec((tb, tn, 1), lambda b, i, k: (b, i, 0)),   # 1/deg (f32)
                pl.BlockSpec((1, Hp), lambda b, i, k: (0, 0)),          # bias (DMA'd once)
            ],
            out_specs=pl.BlockSpec((tb, tn, Hp), lambda b, i, k: (b, i, 0)),
            scratch_shapes=[pltpu.VMEM((tb, tn, Hp), jnp.float32)],     # f32 accumulator
        ),
        input_output_aliases=io_aliases,
        compiler_params=pltpu.CompilerParams(
            dimension_semantics=("parallel", "parallel", "arbitrary"),
            vmem_limit_bytes=vmem_limit),
    )(h_bf, x_pad, adj_i8, inv_deg, b_f32)

    return out[:, :N, :H], node_adj


# ---------------------------------------------------------------------------
# Pure-JAX references
# ---------------------------------------------------------------------------
def reference_f32(nodes_embed, node_adj, W, bias):
    h = jnp.einsum("bnd,dh->bnh", nodes_embed, W)
    sum_nei = jnp.einsum("bnm,bmh->bnh", node_adj, h)
    degs = jnp.sum(node_adj, axis=-1, keepdims=True)
    dst = sum_nei * (1.0 / degs) + bias
    out = jax.nn.relu(dst)
    return nodes_embed + out, node_adj


def reference_bf16(nodes_embed, node_adj, W, bias):
    # Same numerics as the kernels (bf16 MXU inputs, f32 accumulation, exact f32 degrees).
    xb = nodes_embed.astype(jnp.bfloat16)
    wb = W.astype(jnp.bfloat16)
    adjb = node_adj.astype(jnp.bfloat16)
    h = jnp.einsum("bnd,dh->bnh", xb, wb, preferred_element_type=jnp.float32)
    sum_nei = jnp.einsum("bnm,bmh->bnh", adjb, h.astype(jnp.bfloat16),
                         preferred_element_type=jnp.float32)
    degs = jnp.sum(node_adj.astype(jnp.float32), axis=-1, keepdims=True)
    dst = sum_nei * (1.0 / degs) + bias.astype(jnp.float32)
    out = jax.nn.relu(dst)
    return nodes_embed + out, node_adj


if __name__ == "__main__":
    key = jax.random.PRNGKey(0)
    B, N, D = 4, 48, 96            # small, non-multiple-of-128 shapes exercise padding
    H = D

    k1, k2, k3 = jax.random.split(key, 3)
    nodes_embed = jax.random.normal(k1, (B, N, D), dtype=jnp.float32)

    # symmetric 0/1 adjacency with self-loops (degrees > 0)
    a = (jax.random.uniform(k2, (B, N, N)) > 0.5).astype(jnp.float32)
    node_adj = jnp.clip(a + jnp.transpose(a, (0, 2, 1)) + jnp.eye(N)[None], 0.0, 1.0)

    # Xavier-uniform init with gain = calculate_gain('relu') = sqrt(2)
    gain = jnp.sqrt(2.0)
    bound = gain * jnp.sqrt(6.0 / (D + H))
    W = jax.random.uniform(k3, (D, H), minval=-bound, maxval=bound, dtype=jnp.float32)
    bias = jnp.zeros((H,), dtype=jnp.float32)

    out_nodes, out_adj = graph_convolution_layer(nodes_embed, node_adj, W, bias)
    out_nodes = jax.block_until_ready(out_nodes)

    ref32, _ = reference_f32(nodes_embed, node_adj, W, bias)
    ref16, _ = reference_bf16(nodes_embed, node_adj, W, bias)

    # Tight check against the bf16-matmul reference (same numerics as the kernel).
    assert jnp.allclose(out_nodes, ref16, atol=2e-3, rtol=2e-3), "mismatch vs bf16 reference"
    # Loose check against the full-f32 reference (bf16 MXU inputs => ~1e-2 rel error).
    assert jnp.allclose(out_nodes, ref32, atol=5e-2, rtol=5e-2), "mismatch vs f32 reference"
    assert jnp.array_equal(out_adj, node_adj)

    print("KERNEL_OK")
</pallas_src>

<mosaic_0001>
module attributes {stable_mosaic.version = 11 : i64} {
  func.func @xw_kernel(%arg0: i32, %arg1: memref<256x128xbf16, #tpu.memory_space<vmem>>, %arg2: memref<128x128xbf16, #tpu.memory_space<vmem>>, %arg3: memref<256x128xbf16, #tpu.memory_space<vmem>>) attributes {dimension_semantics = [#tpu.dimension_semantics<parallel>], iteration_bounds = array<i64: 2>, scalar_prefetch = 0 : i64, scratch_operands = 0 : i64, tpu.core_type = #tpu.core_type<tc>, window_params = [{transform_indices = @transform_0, window_bounds = array<i64: 256, 128>}, {pipeline_mode = #tpu.pipeline_mode<synchronous>, transform_indices = @transform_1, window_bounds = array<i64: 128, 128>}, {transform_indices = @transform_2, window_bounds = array<i64: 256, 128>}]} {
    %c0 = arith.constant 0 : index
    %c0_0 = arith.constant 0 : index
    %0 = vector.load %arg1[%c0, %c0_0] : memref<256x128xbf16, #tpu.memory_space<vmem>>, vector<256x128xbf16>
    %c0_1 = arith.constant 0 : index
    %c0_2 = arith.constant 0 : index
    %1 = vector.load %arg2[%c0_1, %c0_2] : memref<128x128xbf16, #tpu.memory_space<vmem>>, vector<128x128xbf16>
    %cst = arith.constant dense<0.000000e+00> : vector<256x128xf32>
    %2 = tpu.matmul %0, %1, %cst {dimension_numbers = #tpu.dot_dimension_numbers<[1], [0], [0], [1], [0, 0, 1, 1], [], []>} : vector<256x128xbf16>, vector<128x128xbf16>, vector<256x128xf32> -> vector<256x128xf32>
    %3 = arith.truncf %2 : vector<256x128xf32> to vector<256x128xbf16>
    %c0_3 = arith.constant 0 : index
    %c0_4 = arith.constant 0 : index
    %4 = vector.load %arg3[%c0_3, %c0_4] : memref<256x128xbf16, #tpu.memory_space<vmem>>, vector<256x128xbf16>
    tpu.vector_store %arg3[%c0_3, %c0_4], %3 {strides = array<i32>} : memref<256x128xbf16, #tpu.memory_space<vmem>>, vector<256x128xbf16>,
    return
  }
  func.func @transform_0(%arg0: i32) -> (i32, i32) {
    %c0_i32 = arith.constant 0 : i32
    %c0_i32_0 = arith.constant 0 : i32
    return %arg0, %c0_i32 : i32, i32
  }
  func.func @transform_1(%arg0: i32) -> (i32, i32) {
    %c0_i32 = arith.constant 0 : i32
    %c0_i32_0 = arith.constant 0 : i32
    %c0_i32_1 = arith.constant 0 : i32
    return %c0_i32, %c0_i32_0 : i32, i32
  }
  func.func @transform_2(%arg0: i32) -> (i32, i32) {
    %c0_i32 = arith.constant 0 : i32
    %c0_i32_0 = arith.constant 0 : i32
    return %arg0, %c0_i32 : i32, i32
  }
}

</mosaic_0001>

<bundles_post_ra>
// kernel: tpu_custom_call.1
= control target key start
LH: loop header
LB: loop body
LE: loop exit
PB: predicated region body
PF: predicated region fallthrough
CT: control target
= control target key end

     0   :  { %7 = vsyncpa [#allocation3], 0  ;;  %s1282_s0 = inlined_call_operand.hbm [shape: bf16[512,128], index: 0, kind: input, shape index: {}]   ;;  %s1283_s1 = inlined_call_operand.hbm [shape: bf16[128,128], index: 1, kind: input, shape index: {}]   ;;  %s1284_s2 = inlined_call_operand.hbm [shape: bf16[512,128], index: 2, kind: output, shape index: {}]  }
   0x1   :  { %9 = vsyncpa [#allocation3 + $0x1], 0 }
   0x2   :  { %10 = vsyncpa [#allocation6], 0 }
   0x3   :  { %11 = vsyncpa [#allocation4], 0 }
   0x4   :  { %13 = vsyncpa [#allocation4 + $0x1], 0  ;;  %s1097_s9 = smov 0   ;;  %s1099_s10 = smov 0  }
   0x5   :  { %s1101_s11 = smov 0   ;;  %s1103_s12 = smov 0  }
   0x6 LB: > { %s1118_s13 = sadd.s32 4294967295, %s1075_s12   ;;  %s627_s14 = sadd.s32 4294967294, %s1075_s12   ;;  %s1075_s12 = sphi %s1103_s12, %s1294_s12   ;;  %s1071_s11 = sphi %s1101_s11, %s1293_s11   ;;  %s1067_s10 = sphi %s1099_s10, %s1292_s10   ;;  %s1063_s9 = sphi %s1097_s9, %s1291_s9  }
   0x7   : > { %p39_p0 = scmp.ne.s32.totalorder %s1067_s10, %s1063_s9  ;;  %p40_p1 = scmp.eq.s32.totalorder %s1118_s13, 0 }
   0x8   : > { %p84_p2 = scmp.eq.s32.totalorder %s1118_s13, 1  ;;  %p90_p3 = scmp.eq.s32.totalorder %s627_s14, 1 }
   0x9   : > { %p1127_p4 = por %p40_p1, %p39_p0  ;;  %p628_p5 = scmp.ge.s32.totalorder %s1075_s12, 1 }
   0xa   : > { %p1132_p6 = por %p90_p3, %p39_p0  ;;  %p97_p7 = scmp.lt.s32.totalorder %s1075_s12, 3 }
   0xb   : > { %s108_s19 = sshll.u32 %s1283_s1, 4  ;;  %s1077_s21 = smov [#allocation5]   ;;  %s109_s19 = int_to_ptr.hbm [resolvable:$true] %s108_s19 }
   0xc   : > { %p1140_p8 = pnand %p628_p5, %p97_p7  ;;  %s110_s22 = sshll.u32 %s1077_s21, 4  ;;  %s111_s22 = int_to_ptr.vmem [resolvable:$true] %s110_s22 }
   0xd   : > { %s1150_s23 = sadd.s32 1, %s1075_s12   ;;  %s1078_s24 = smov 64  }
   0xe   : > { %p892_p9 = pneg %p1140_p8  ;;  %s1079_s25 = smov 4  }
   0xf   : > { %s23_s26 = ssub.s32 %s1075_s12, %s1150_s23  ;;  %s26_s27 = sadd.s32 1, %s1071_s11 }
  0x10   : > { %p893_p10 = pnand %p892_p9, %p40_p1  ;;  %p24_p12 = scmp.eq.s32.totalorder %s23_s26, 0 }
  0x11   : > { %p33_p13 = scmp.ne.s32.totalorder %s1071_s11, %s1067_s10  ;;  %p34_p0 = scmp.eq.s32.totalorder %s1075_s12, 0 }
  0x12   : > { %895 = dma.hbm_to_vmem [thread:$0]  (!%p893_p10), %s109_s19, 1024, %s111_s22, [#allocation6], %s1078_s24, %s1078_s24, %s1079_s25  }
  0x13   : > { %s1162_s28 = scalar_select %p24_p12, %s1071_s11, %s26_s27  }
  0x14   : > { %p1166_p3 = por %p84_p2, %p33_p13  ;;  %p905_p5 = scmp.lt.s32.totalorder %s1075_s12, 2 }
  0x15   : > { %s124_s30 = sand.u32 1, %s1071_s11   ;;  %s739_s3 = sshll.u32 %s1075_s12, 7 }
  0x16   : > { %p35_p7 = por %p34_p0, %p33_p13  ;;  %s631_s4 = sshll.u32 %s124_s30, 7 }
  0x17   : > { %s133_s7 = scalar_lea.hbm %s1282_s0, %s739_s3  ;;  %s128_s14 = scalar_lea.vmem [#allocation2], %s631_s4 }
  0x18   : > { %s134_s8 = sshll.u32 %s133_s7, 4  ;;  %s136_s17 = sshll.u32 %s128_s14, 4  ;;  %s135_s8 = int_to_ptr.hbm [resolvable:$true] %s134_s8  ;;  %s137_s17 = int_to_ptr.vmem [resolvable:$true] %s136_s17 }
  0x19   : > { %p1176_p9 = pnand %p905_p5, %p35_p7  ;;  %s125_s19 = scalar_lea.sflag [#allocation3], %s124_s30 }
  0x1a   : > { %s975_s21 = sshra.s32 %s135_s8, 4  ;;  %s982_s3 = scalar_lea.hbm %s1282_s0, 256  ;;  %s976_s21 = int_to_ptr.hbm [resolvable:$true] %s975_s21 }
  0x1b   : > { %s977_s22 = scalar_lea.hbm %s976_s21, 128  ;;  %p979_p10 = pneg %p1176_p9 }
  0x1c   : > { %p978_p2 = scmp.ne.s32.totalorder %s976_s21, %s977_s22  ;;  %p983_p0 = scmp.lt.s32.totalorder %s976_s21, %s1282_s0 }
  0x1d   : > { %p984_p5 = scmp.lt.s32.totalorder %s982_s3, %s977_s22 }
  0x1e   : > { %p980_p12 = pnand %p979_p10, %p978_p2 }
  0x1f   : > { %p985_p7 = por %p984_p5, %p983_p0 }
  0x20   : > { %p981_p13 = pneg %p980_p12 }
  0x22   : > { %p986_p11 = pnand %p985_p7, %p981_p13 }
  0x24   : > { %989 = shalt.err (!%p986_p11)
}
  0x25   : > { %899 = dma.hbm_to_vmem [thread:$0]  (!%p1176_p9), %s135_s8, 2048, %s137_s17, %s125_s19, %s1078_s24, %s1078_s24, %s1079_s25  }
  0x26   : > { %148 = sbr.rel (%p1140_p8) target bundleno = 274 (0x112), region = 28  ;;  %s1196_s30 = sand.u32 (!%p1140_p8), 1, %s1067_s10  }
  0x27   : > { %s635_s6 = sshll.u32 (!%p1140_p8), %s1196_s30, 7  ;;  %s151_s7 = scalar_lea.sflag (!%p1140_p8), [#allocation3], %s1196_s30 }
  0x28   : > { %s1202_s14 = scalar_lea.vmem (!%p1140_p8), [#allocation2], %s635_s6 }
  0x2b   : > { %1050 = dma.done.wait (%p1127_p4), %s151_s7, 2048  }
  0x2c   : > { %1052 = vsyncadd (%p1127_p4), %s151_s7, 4294965248 }
  0x2d   : > { %1054 = dma.done.wait (%p40_p1), [#allocation6], 1024  }
  0x2e   : > { %1056 = vsyncadd (%p40_p1), [#allocation6], 4294966272  ;;  %v763_v0 = vld [vmem:[#allocation5 + $0x38] sm:$0xff]  ;;  %v762_v1 = vld [vmem:[#allocation5 + $0x30] sm:$0xff]  ;;  %s1230_s15 = scalar_lea.vmem [#allocation7], %s635_s6  ;;  %s764_s20 = sshll.u32 %s1118_s13, 7 }
  0x2f   : > { %375 = vmatpush.bf16.msra.mxu0 %v763_v0  ;;  %860 = vmatpush.bf16.msra.mxu1 %v763_v0  ;;  %v761_v2 = vld [vmem:[#allocation5 + $0x28] sm:$0xff]  ;;  %v760_v3 = vld [vmem:[#allocation5 + $0x20] sm:$0xff]  ;;  %v759_v4 = vld [vmem:[#allocation5 + $0x18] sm:$0xff]  ;;  %s540_s8 = scalar_lea.hbm %s1284_s2, %s764_s20  ;;  %s541_s17 = sshll.u32 %s1230_s15, 4  ;;  %s542_s17 = int_to_ptr.vmem [resolvable:$true] %s541_s17 }
  0x30   : > { %861 = vmatpush.bf16.msra.mxu2 %v763_v0  ;;  %862 = vmatpush.bf16.msra.mxu3 %v763_v0  ;;  %v758_v5 = vld [vmem:[#allocation5 + $0x10] sm:$0xff]  ;;  %v757_v6 = vld [vmem:[#allocation5 + $0x8] sm:$0xff]  ;;  %v756_v7 = vld [vmem:[#allocation5] sm:$0xff]  ;;  %s543_s18 = sshll.u32 %s540_s8, 4  ;;  %s529_s13 = scalar_lea.sflag [#allocation4], %s1196_s30  ;;  %s544_s18 = int_to_ptr.hbm [resolvable:$true] %s543_s18 }
  0x31   : > { %v740_v8 = vld [vmem:[%s1202_s14] sm:$0xff]  ;;  %v741_v12 = vld [vmem:[%s1202_s14 + $0x8] sm:$0xff]  ;;  %v742_v16 = vld [vmem:[%s1202_s14 + $0x10] sm:$0xff]  ;;  %s1019_s19 = sshra.s32 %s544_s18, 4  ;;  %s1025_s27 = scalar_lea.hbm %s1284_s2, 256  ;;  %s1020_s19 = int_to_ptr.hbm [resolvable:$true] %s1019_s19 }
  0x32   : > { %v744_v9 = vld [vmem:[%s1202_s14 + $0x20] sm:$0xff]  ;;  %v745_v13 = vld [vmem:[%s1202_s14 + $0x28] sm:$0xff]  ;;  %v746_v17 = vld [vmem:[%s1202_s14 + $0x30] sm:$0xff]  ;;  %s1021_s21 = scalar_lea.hbm %s1020_s19, 128  ;;  %p1026_p11 = scmp.lt.s32.totalorder %s1020_s19, %s1284_s2 }
  0x33   : > { %376 = vmatpush.bf16.msra.mxu0 %v762_v1  ;;  %863 = vmatpush.bf16.msra.mxu1 %v762_v1  ;;  %v748_v10 = vld [vmem:[%s1202_s14 + $0x40] sm:$0xff]  ;;  %v749_v14 = vld [vmem:[%s1202_s14 + $0x48] sm:$0xff]  ;;  %v750_v18 = vld [vmem:[%s1202_s14 + $0x50] sm:$0xff]  ;;  %p1022_p1 = scmp.ne.s32.totalorder %s1020_s19, %s1021_s21  ;;  %p1027_p9 = scmp.lt.s32.totalorder %s1025_s27, %s1021_s21 }
  0x34   : > { %864 = vmatpush.bf16.msra.mxu2 %v762_v1  ;;  %865 = vmatpush.bf16.msra.mxu3 %v762_v1  ;;  %v752_v11 = vld [vmem:[%s1202_s14 + $0x60] sm:$0xff]  ;;  %v753_v15 = vld [vmem:[%s1202_s14 + $0x68] sm:$0xff]  ;;  %v754_v19 = vld [vmem:[%s1202_s14 + $0x70] sm:$0xff] }
  0x35   : > { %v743_v20 = vld [vmem:[%s1202_s14 + $0x18] sm:$0xff]  ;;  %p1023_p4 = pnand %p1022_p1, %p1166_p3  ;;  %p1028_p2 = por %p1027_p9, %p1026_p11 }
  0x36   : > { %v747_v21 = vld [vmem:[%s1202_s14 + $0x38] sm:$0xff] }
  0x37   : > { %377 = vmatpush.bf16.msra.mxu0 %v761_v2  ;;  %866 = vmatpush.bf16.msra.mxu1 %v761_v2  ;;  %v751_v22 = vld [vmem:[%s1202_s14 + $0x58] sm:$0xff]  ;;  %p1024_p8 = pneg %p1023_p4 }
  0x38   : > { %867 = vmatpush.bf16.msra.mxu2 %v761_v2  ;;  %868 = vmatpush.bf16.msra.mxu3 %v761_v2  ;;  %v755_v23 = vld [vmem:[%s1202_s14 + $0x78] sm:$0xff] }
  0x39   : > { %p1029_p10 = pnand %p1028_p2, %p1024_p8 }
  0x3b   : > { %378 = vmatpush.bf16.msra.mxu0 %v760_v3  ;;  %869 = vmatpush.bf16.msra.mxu1 %v760_v3 }
  0x3c   : > { %870 = vmatpush.bf16.msra.mxu2 %v760_v3  ;;  %871 = vmatpush.bf16.msra.mxu3 %v760_v3 }
  0x3f   : > { %379 = vmatpush.bf16.msra.mxu0 %v759_v4  ;;  %872 = vmatpush.bf16.msra.mxu1 %v759_v4 }
  0x40   : > { %873 = vmatpush.bf16.msra.mxu2 %v759_v4  ;;  %874 = vmatpush.bf16.msra.mxu3 %v759_v4 }
  0x43   : > { %380 = vmatpush.bf16.msra.mxu0 %v758_v5  ;;  %875 = vmatpush.bf16.msra.mxu1 %v758_v5 }
  0x44   : > { %876 = vmatpush.bf16.msra.mxu2 %v758_v5  ;;  %877 = vmatpush.bf16.msra.mxu3 %v758_v5 }
  0x47   : > { %381 = vmatpush.bf16.msra.mxu0 %v757_v6  ;;  %878 = vmatpush.bf16.msra.mxu1 %v757_v6 }
  0x48   : > { %879 = vmatpush.bf16.msra.mxu2 %v757_v6  ;;  %880 = vmatpush.bf16.msra.mxu3 %v757_v6 }
  0x4b   : > { %382 = vmatpush.bf16.msra.mxu0 %v756_v7  ;;  %881 = vmatpush.bf16.msra.mxu1 %v756_v7 }
  0x4c   : > { %882 = vmatpush.bf16.msra.mxu2 %v756_v7  ;;  %883 = vmatpush.bf16.msra.mxu3 %v756_v7 }
  0x4e   : > { %383 = vmatmul.bf16.vlgmr.msra.gmra.mxu0 %v740_v8  ;;  %403 = vmatmul.bf16.vlgmr.msra.gmra.mxu1 %v744_v9 }
  0x4f   : > { %423 = vmatmul.bf16.vlgmr.msra.gmra.mxu2 %v748_v10  ;;  %443 = vmatmul.bf16.vlgmr.msra.gmra.mxu3 %v752_v11 }
  0x5e   : > { %388 = vmatmul.bf16.gmra.mxu0 %v741_v12  ;;  %408 = vmatmul.bf16.gmra.mxu1 %v745_v13 }
  0x5f   : > { %428 = vmatmul.bf16.gmra.mxu2 %v749_v14  ;;  %448 = vmatmul.bf16.gmra.mxu3 %v753_v15 }
  0x6e   : > { %393 = vmatmul.bf16.gmra.mxu0 %v742_v16  ;;  %413 = vmatmul.bf16.gmra.mxu1 %v746_v17 }
  0x6f   : > { %433 = vmatmul.bf16.gmra.mxu2 %v750_v18  ;;  %453 = vmatmul.bf16.gmra.mxu3 %v754_v19 }
  0x7e   : > { %398 = vmatmul.bf16.gmra.mxu0 %v743_v20  ;;  %418 = vmatmul.bf16.gmra.mxu1 %v747_v21 }
  0x7f   : > { %438 = vmatmul.bf16.gmra.mxu2 %v751_v22  ;;  %458 = vmatmul.bf16.gmra.mxu3 %v755_v23 }
  0xcb   : > { %v384_v24 = vpop.f32.mrf.mxu0  ;;  %v404_v25 = vpop.f32.mrf.mxu1 }
  0xd2   : > { %v424_v26 = vpop.f32.mrf.mxu2  ;;  %v444_v27 = vpop.f32.mrf.mxu3 }
  0xd3   : > { %v386_v28 = vpop.f32.mrf.mxu0  ;;  %v406_v29 = vpop.f32.mrf.mxu1 }
  0xd4   : > { %v768_v30 = vpack.c.bf16 %v386_v28, %v384_v24  ;;  %v788_v31 = vpack.c.bf16 %v406_v29, %v404_v25 }
  0xd6   : > { %769 = vst [vmem:[%s1230_s15] sm:$0xff] %v768_v30  }
  0xd7   : > { %848 = vst [vmem:[%s1230_s15 + $0x20] sm:$0xff] %v788_v31  }
  0xda   : > { %v426_v32 = vpop.f32.mrf.mxu2  ;;  %v446_v33 = vpop.f32.mrf.mxu3 }
  0xdb   : > { %v808_v34 = vpack.c.bf16 %v426_v32, %v424_v26  ;;  %v828_v35 = vpack.c.bf16 %v446_v33, %v444_v27  ;;  %v389_v36 = vpop.f32.mrf.mxu0  ;;  %v409_v37 = vpop.f32.mrf.mxu1 }
  0xdd   : > { %852 = vst [vmem:[%s1230_s15 + $0x40] sm:$0xff] %v808_v34  }
  0xde   : > { %856 = vst [vmem:[%s1230_s15 + $0x60] sm:$0xff] %v828_v35  }
  0xe2   : > { %v429_v38 = vpop.f32.mrf.mxu2  ;;  %v449_v39 = vpop.f32.mrf.mxu3 }
  0xe3   : > { %v391_v40 = vpop.f32.mrf.mxu0  ;;  %v411_v41 = vpop.f32.mrf.mxu1 }
  0xe4   : > { %v773_v42 = vpack.c.bf16 %v391_v40, %v389_v36  ;;  %v793_v43 = vpack.c.bf16 %v411_v41, %v409_v37 }
  0xe6   : > { %845 = vst [vmem:[%s1230_s15 + $0x8] sm:$0xff] %v773_v42  }
  0xe7   : > { %849 = vst [vmem:[%s1230_s15 + $0x28] sm:$0xff] %v793_v43  }
  0xea   : > { %v431_v44 = vpop.f32.mrf.mxu2  ;;  %v451_v45 = vpop.f32.mrf.mxu3 }
  0xeb   : > { %v813_v46 = vpack.c.bf16 %v431_v44, %v429_v38  ;;  %v833_v47 = vpack.c.bf16 %v451_v45, %v449_v39  ;;  %v394_v48 = vpop.f32.mrf.mxu0  ;;  %v414_v49 = vpop.f32.mrf.mxu1 }
  0xed   : > { %853 = vst [vmem:[%s1230_s15 + $0x48] sm:$0xff] %v813_v46  }
  0xee   : > { %857 = vst [vmem:[%s1230_s15 + $0x68] sm:$0xff] %v833_v47  }
  0xf2   : > { %v434_v50 = vpop.f32.mrf.mxu2  ;;  %v454_v51 = vpop.f32.mrf.mxu3 }
  0xf3   : > { %v396_v52 = vpop.f32.mrf.mxu0  ;;  %v416_v53 = vpop.f32.mrf.mxu1 }
  0xf4   : > { %v778_v54 = vpack.c.bf16 %v396_v52, %v394_v48  ;;  %v798_v55 = vpack.c.bf16 %v416_v53, %v414_v49 }
  0xf6   : > { %846 = vst [vmem:[%s1230_s15 + $0x10] sm:$0xff] %v778_v54  }
  0xf7   : > { %850 = vst [vmem:[%s1230_s15 + $0x30] sm:$0xff] %v798_v55  }
  0xfa   : > { %v436_v56 = vpop.f32.mrf.mxu2  ;;  %v456_v57 = vpop.f32.mrf.mxu3 }
  0xfb   : > { %v818_v58 = vpack.c.bf16 %v436_v56, %v434_v50  ;;  %v838_v59 = vpack.c.bf16 %v456_v57, %v454_v51  ;;  %v399_v60 = vpop.f32.mrf.mxu0  ;;  %v419_v61 = vpop.f32.mrf.mxu1 }
  0xfd   : > { %854 = vst [vmem:[%s1230_s15 + $0x50] sm:$0xff] %v818_v58  }
  0xfe   : > { %858 = vst [vmem:[%s1230_s15 + $0x70] sm:$0xff] %v838_v59  }
 0x102   : > { %v439_v62 = vpop.f32.mrf.mxu2  ;;  %v459_v63 = vpop.f32.mrf.mxu3 }
 0x103   : > { %v401_v0 = vpop.f32.mrf.mxu0  ;;  %v421_v1 = vpop.f32.mrf.mxu1 }
 0x104   : > { %v783_v2 = vpack.c.bf16 %v401_v0, %v399_v60  ;;  %v803_v3 = vpack.c.bf16 %v421_v1, %v419_v61 }
 0x106   : > { %847 = vst [vmem:[%s1230_s15 + $0x18] sm:$0xff] %v783_v2  }
 0x107   : > { %851 = vst [vmem:[%s1230_s15 + $0x38] sm:$0xff] %v803_v3  }
 0x10a   : > { %v441_v4 = vpop.f32.mrf.mxu2  ;;  %v461_v5 = vpop.f32.mrf.mxu3 }
 0x10b   : > { %v823_v6 = vpack.c.bf16 %v441_v4, %v439_v62  ;;  %v843_v7 = vpack.c.bf16 %v461_v5, %v459_v63 }
 0x10d   : > { %855 = vst [vmem:[%s1230_s15 + $0x58] sm:$0xff] %v823_v6  }
 0x10e   : > { %859 = vst [vmem:[%s1230_s15 + $0x78] sm:$0xff] %v843_v7  }
 0x10f   : > { %1032 = shalt.err (!%p1029_p10)
}
 0x110   : > { %s1080_s5 = smov 64   ;;  %s1081_s30 = smov 4  }
 0x111   : > { %890 = dma.vmem_to_hbm [thread:$0]  (%p1166_p3), %s542_s17, 2048, %s544_s18, %s529_s13, %s1080_s5, %s1080_s5, %s1081_s30  }
 0x112 PF: > { %s558_s6 = sand.u32 1, %s1063_s9   ;;  %p1290_p12 = scmp.ge.s32.totalorder %s1075_s12, 2 }
 0x113   : > { %s559_s7 = scalar_lea.sflag [#allocation4], %s558_s6 }
 0x114   : > { %p901_p13 = pnand %p1290_p12, %p1132_p6 }
 0x116   : > { %p902_p0 = pneg %p901_p13 }
 0x118   : > { %1058 = dma.done.wait (%p902_p0), %s559_s7, 2048  }
 0x119   : > { %1060 = vsyncadd (%p902_p0), %s559_s7, 4294965248  ;;  %p16_p5 = scmp.ge.s32.totalorder %s1150_s23, 4   ;;  %s1291_s9 = smov %s1067_s10 }
 0x11a   : > { %s1292_s10 = smov %s1071_s11  ;;  %s1293_s11 = smov %s1162_s28 }
 0x11b   : > { %s1294_s12 = smov %s1150_s23  ;;  %18 = sbr.rel (!%p16_p5) target bundleno = 6 (0x6), region = 77 }
 0x120   :  { %565 = vsyncpa [#allocation3], 1 }
 0x121   :  { %567 = vsyncpa [#allocation3 + $0x1], 1 }
 0x122   :  { %568 = vsyncpa [#allocation6], 1 }
 0x123   :  { %569 = vsyncpa [#allocation4], 1 }
 0x124   :  { %571 = vsyncpa [#allocation4 + $0x1], 1 }

</bundles_post_ra>
